<compile_context>
chip_gen: v5e
topology: v5e:2x2
jax: 0.10.0
libtpu: 0.0.40
codegen_flags: <defaults>
</compile_context>

<pallas_src>
import jax
import jax.numpy as jnp
from jax.experimental import pallas as pl
from jax.experimental.pallas import tpu as pltpu


_LANE = 128
_MIN_LANE_N = 128                 # below this, fall back to pure JAX
_MIN_BLOCK_BYTES = 512 * 1024     # don't shrink blocks below this for parallelism


def _token_shift_kernel(x_ref, o_ref):
    """x_ref / o_ref: (1, cblk, T, nblk) VMEM blocks of the shifted channel half."""
    x = x_ref[...]
    t = x.shape[2]
    # Rotate frames forward by one along T (sublane axis) on the XLU, then zero
    # frame 0 with a VPU select.  Single full, unmasked store of the block.
    rolled = pltpu.roll(x, shift=1, axis=2) if t > 1 else x
    frame = jax.lax.broadcasted_iota(jnp.int32, x.shape, dimension=2)
    o_ref[...] = jnp.where(frame == 0, jnp.zeros_like(rolled), rolled)


def _divisors(n):
    small, large = [], []
    i = 1
    while i * i <= n:
        if n % i == 0:
            small.append(i)
            if i != n // i:
                large.append(n // i)
        i += 1
    return small + large[::-1]


def _vmem_capacity_bytes():
    """Physical VMEM of the local TPU; conservative (v7x-sized) on failure."""
    try:
        info = pltpu.get_tpu_info()
        cap = getattr(info, "vmem_capacity_bytes", None)
        if cap:
            return int(cap)
    except Exception:
        pass
    return 64 * 1024 * 1024


def _choose_tiling(batch, half, t, n, itemsize, target_bytes, min_blocks):
    """Pick (cblk, nblk): channel-block and lane-block sizes.

    Both are exact divisors (no ragged edges, so the aliased in-place update
    never touches the unshifted half).  Preference order:
      1. enough grid blocks (>= min_blocks) to feed both v7x TensorCores,
         but only among blocks that stay >= _MIN_BLOCK_BYTES,
      2. the largest block <= target_bytes.
    """
    if n % _LANE == 0:
        n_cands = [d for d in _divisors(n) if d % _LANE == 0]
    else:
        n_cands = [n]              # full-extent lane block (only legal choice)
    c_cands = _divisors(half)

    best_key, best = None, None
    for nb in n_cands:
        for cb in c_cands:
            blk_bytes = cb * t * nb * itemsize
            n_blocks = batch * (half // cb) * (n // nb)
            feasible = blk_bytes <= target_bytes
            big_enough = blk_bytes >= _MIN_BLOCK_BYTES
            key = (
                feasible,
                min(n_blocks, min_blocks) if (feasible and big_enough) else 0,
                blk_bytes if feasible else -blk_bytes,
            )
            if best_key is None or key > best_key:
                best_key, best = key, (cb, nb)
    return best


def _token_shift_jax(x):
    """Pure-JAX fallback / reference of the forward pass (fn = identity)."""
    x_a, x_b = jnp.split(x, 2, axis=1)
    x_b = jnp.pad(x_b, ((0, 0), (0, 0), (1, 0), (0, 0), (0, 0)))[:, :, :-1]
    return jnp.concatenate([x_a, x_b], axis=1)


def token_shift(x, fn=None, *, input_buffers=2):
    """TokenShift forward. x: (B, C, T, H, W), PyTorch NCTHW layout.

    The pallas_call aliases its output onto the input; for zero-copy behaviour
    the caller should donate x (e.g. jit(..., donate_argnums=...)) or ensure
    this is x's last use.
    """
    B, C, T, H, W = x.shape
    assert C % 2 == 0, "channel dim must be even to chunk into two halves"
    half = C // 2
    N = H * W

    # Small-spatial guard: with < 128 lanes the stores are mostly masked and
    # launch overhead dominates; XLA fuses the pad/slice fine at that size.
    if N < _MIN_LANE_N:
        out = _token_shift_jax(x)
        return fn(out) if fn is not None else out

    xr = x.reshape(B, C, T, N)     # trailing-dim merge: free, lane-dense
    itemsize = jnp.dtype(x.dtype).itemsize

    # Generation-aware block target / VMEM budget.
    # Budget ~= block_bytes * 2 buffers * (in + out) must stay under the limit.
    if _vmem_capacity_bytes() >= 96 * 1024 * 1024:     # v5e / v6e (128 MiB VMEM)
        target_bytes, vmem_limit = 8 * 1024 * 1024, 64 * 1024 * 1024
    else:                                               # v7x (64 MiB VMEM)
        target_bytes, vmem_limit = 2 * 1024 * 1024, 32 * 1024 * 1024

    cblk, nblk = _choose_tiling(B, half, T, N, itemsize, target_bytes,
                                min_blocks=8)
    c_off = half // cblk           # block offset of the second channel half
    grid = (B, half // cblk, N // nblk)
    block = (1, cblk, T, nblk)

    def idx_map(b, c, n):
        return (b, c_off + c, 0, n)

    if input_buffers > 2 and hasattr(pl, "Buffered"):
        # Optional deeper input pipelining (worth sweeping 2 vs 3, esp. v7x):
        # keeps a read in flight across the write-back boundary.
        in_spec = pl.BlockSpec(block, idx_map,
                               pipeline_mode=pl.Buffered(input_buffers))
    else:
        in_spec = pl.BlockSpec(block, idx_map)

    out = pl.pallas_call(
        _token_shift_kernel,
        out_shape=jax.ShapeDtypeStruct(xr.shape, xr.dtype),
        grid_spec=pltpu.PrefetchScalarGridSpec(
            num_scalar_prefetch=0,
            grid=grid,
            in_specs=[in_spec],
            out_specs=pl.BlockSpec(block, idx_map),
        ),
        # Output aliases the input: the unshifted first channel half is never
        # read or written by the kernel and simply stays in place in HBM.
        input_output_aliases={0: 0},
        compiler_params=pltpu.CompilerParams(
            dimension_semantics=("parallel", "parallel", "parallel"),
            vmem_limit_bytes=vmem_limit,
        ),
        # Pure memory op: read half the tensor + write half the tensor.
        cost_estimate=pl.CostEstimate(
            flops=0, transcendentals=0,
            bytes_accessed=int(xr.size) * itemsize),
    )(xr)

    out = out.reshape(B, C, T, H, W)
    # TODO(synk): `fn` is an arbitrary user-supplied submodule in the PyTorch
    # module (TokenShift itself has no parameters); identity by default.
    if fn is not None:
        out = fn(out)
    return out


if __name__ == "__main__":
    key = jax.random.PRNGKey(0)

    # Kernel-path shapes: N = H*W = 128 lanes, T = 8 frames (one native f32
    # sublane tile), prime channel-half (C=6 -> half=3) to exercise the tiler.
    B, C, T, H, W = 2, 6, 8, 8, 16
    x = jax.random.normal(key, (B, C, T, H, W), dtype=jnp.float32)

    # Compute the reference first: the kernel call below donates x so the
    # shift can truly happen in place.
    ref = _token_shift_jax(x)
    jax.block_until_ready(ref)

    token_shift_inplace = jax.jit(token_shift, donate_argnums=0)
    out = token_shift_inplace(x)
    jax.block_until_ready(out)
    assert out.shape == ref.shape and out.dtype == ref.dtype
    assert jnp.allclose(out, ref, atol=1e-6), "kernel mismatch vs reference"

    # Small-spatial fallback path (N < 128) stays correct too.
    x2 = jax.random.normal(jax.random.PRNGKey(1), (2, 4, 5, 4, 4),
                           dtype=jnp.float32)
    ref2 = _token_shift_jax(x2)
    out2 = jax.jit(token_shift)(x2)
    jax.block_until_ready(out2)
    assert jnp.allclose(out2, ref2, atol=1e-6), "fallback mismatch vs reference"

    print("KERNEL_OK")
</pallas_src>

<mosaic_0001>
module attributes {stable_mosaic.version = 11 : i64} {
  func.func @_token_shift_kernel(%arg0: i32, %arg1: i32, %arg2: i32, %arg3: memref<1x3x8x128xf32, #tpu.memory_space<vmem>>, %arg4: memref<1x3x8x128xf32, #tpu.memory_space<vmem>>) attributes {dimension_semantics = [#tpu.dimension_semantics<parallel>, #tpu.dimension_semantics<parallel>, #tpu.dimension_semantics<parallel>], iteration_bounds = array<i64: 2, 1, 1>, scalar_prefetch = 0 : i64, scratch_operands = 0 : i64, tpu.core_type = #tpu.core_type<tc>, window_params = [{transform_indices = @transform_0, window_bounds = array<i64: 1, 3, 8, 128>}, {transform_indices = @transform_1, window_bounds = array<i64: 1, 3, 8, 128>}]} {
    %c0 = arith.constant 0 : index
    %c0_0 = arith.constant 0 : index
    %c0_1 = arith.constant 0 : index
    %c0_2 = arith.constant 0 : index
    %0 = vector.load %arg3[%c0, %c0_0, %c0_1, %c0_2] : memref<1x3x8x128xf32, #tpu.memory_space<vmem>>, vector<1x3x8x128xf32>
    %c1_i32 = arith.constant 1 : i32
    %1 = tpu.dynamic_rotate %0 by %c1_i32 dim 2 : vector<1x3x8x128xf32>, i32 -> vector<1x3x8x128xf32>
    %2 = tpu.iota {dimensions = array<i32: 2>} : vector<1x3x8x128xi32>
    %c0_i32 = arith.constant 0 : i32
    %3 = vector.broadcast %c0_i32 : i32 to vector<1x3x8x128xi32>
    %4 = arith.cmpi eq, %2, %3 : vector<1x3x8x128xi32>
    %cst = arith.constant 0.000000e+00 : f32
    %5 = vector.broadcast %cst : f32 to vector<1x3x8x128xf32>
    %6 = arith.select %4, %5, %1 : vector<1x3x8x128xi1>, vector<1x3x8x128xf32>
    %c0_3 = arith.constant 0 : index
    %c0_4 = arith.constant 0 : index
    %c0_5 = arith.constant 0 : index
    %c0_6 = arith.constant 0 : index
    %7 = vector.load %arg4[%c0_3, %c0_4, %c0_5, %c0_6] : memref<1x3x8x128xf32, #tpu.memory_space<vmem>>, vector<1x3x8x128xf32>
    tpu.vector_store %arg4[%c0_3, %c0_4, %c0_5, %c0_6], %6 {strides = array<i32>} : memref<1x3x8x128xf32, #tpu.memory_space<vmem>>, vector<1x3x8x128xf32>,
    return
  }
  func.func @transform_0(%arg0: i32, %arg1: i32, %arg2: i32) -> (i32, i32, i32, i32) {
    %c1_i32 = arith.constant 1 : i32
    %0 = arith.addi %c1_i32, %arg1 : i32
    %c0_i32 = arith.constant 0 : i32
    %c0_i32_0 = arith.constant 0 : i32
    return %arg0, %0, %c0_i32, %arg2 : i32, i32, i32, i32
  }
  func.func @transform_1(%arg0: i32, %arg1: i32, %arg2: i32) -> (i32, i32, i32, i32) {
    %c1_i32 = arith.constant 1 : i32
    %0 = arith.addi %c1_i32, %arg1 : i32
    %c0_i32 = arith.constant 0 : i32
    %c0_i32_0 = arith.constant 0 : i32
    return %arg0, %0, %c0_i32, %arg2 : i32, i32, i32, i32
  }
}

</mosaic_0001>

<bundles_post_ra>
// kernel: token_shift.1
= control target key start
LH: loop header
LB: loop body
LE: loop exit
PB: predicated region body
PF: predicated region fallthrough
CT: control target
= control target key end

     0   :  { %s388_s6 = smov 0   ;;  %s390_s7 = smov 0   ;;  %s418_s0 = inlined_call_operand.vmem [shape: f32[2,6,8,128], index: 0, kind: input, shape index: {}, may-alias: {0,1}]   ;;  %s419_s1 = inlined_call_operand.vmem [shape: f32[2,6,8,128], index: 1, kind: output, shape index: {}, may-alias: {0,1}]  }
   0x1   :  { %s392_s8 = smov 0  }
   0x2 LB: > { %s30_s9 = sadd.s32 1, %s372_s7  ;;  %p319_p0 = scmp.ge.s32.totalorder %s376_s8, 1  ;;  %s376_s8 = sphi %s392_s8, %s11_s8   ;;  %s372_s7 = sphi %s390_s7, %s421_s7   ;;  %s368_s6 = sphi %s388_s6, %s420_s6  }
   0x3   : > { %p32_p1 = scmp.ge.s32.totalorder %s30_s9, 2  ;;  %p128_p2 = scmp.lt.s32.totalorder %s376_s8, 3 }
   0x5   : > { %s423_s9 = smov (%p32_p1, %s30_s9), 0  ;;  %p129_p3 = pnand %p319_p0, %p128_p2 }
   0x6   : > { %p166_p4 = scmp.lt.s32.totalorder (!%p129_p3), %s368_s6, 1 }
   0x7   : > { %132 = sbr.rel (%p129_p3) target bundleno = 24 (0x18), region = 24 }
   0xc   : > { %v200_v0 = vlaneseq  ;;  %s425_s6 = smov (!%p166_p4, %s368_s6), 1 }
   0xd   : > { %s329_s10 = smul.u32 48, %s425_s6 }
   0xe   : > { %v201_v1 = vshrl.u32 %v200_v0, 7 }
   0xf   : > { %s325_s11 = sadd.s32 24, %s329_s10 }
  0x10   : > { %s176_s14 = scalar_lea.vmem %s418_s0, %s325_s11  ;;  %vm202_vm0 = vcmp.eq.s32.totalorder %v201_v1, 0  ;;  %s191_s17 = scalar_lea.vmem %s419_s1, %s325_s11 }
  0x11   : > { %v194_v2 = vld [vmem:[%s176_s14] sm:$0xff]  ;;  %v195_v3 = vld [vmem:[%s176_s14 + $0x8] sm:$0xff]  ;;  %v196_v4 = vld [vmem:[%s176_s14 + $0x10] sm:$0xff] }
  0x12   : > { %v197_v5 = vrot.slane %v194_v2, 7  ;;  %v198_v6 = vrot.slane %v195_v3, 7  ;;  %v199_v7 = vrot.slane %v196_v4, 7 }
  0x14   : > { %v203_v8 = vsel %vm202_vm0, 0.0, %v197_v5  ;;  %v204_v9 = vsel %vm202_vm0, 0.0, %v198_v6  ;;  %v205_v10 = vsel %vm202_vm0, 0.0, %v199_v7 }
  0x15   : > { %206 = vst [vmem:[%s191_s17] sm:$0xff] %v203_v8 }
  0x16   : > { %207 = vst [vmem:[%s191_s17 + $0x8] sm:$0xff] %v204_v9 }
  0x17   : > { %208 = vst [vmem:[%s191_s17 + $0x10] sm:$0xff] %v205_v10 }
  0x18 PF: > { %s11_s8 = sadd.s32 1, %s376_s8   ;;  %s420_s6 = smov %s372_s7 }
  0x19   : > { %p8_p5 = scmp.ge.s32.totalorder %s11_s8, 4   ;;  %s421_s7 = smov %s423_s9 }
  0x1b   :  { %10 = sbr.rel (!%p8_p5) target bundleno = 2 (0x2), region = 54 }

</bundles_post_ra>
